<compile_context>
chip_gen: v7x
topology: tpu7x:2x2x1
jax: 0.10.0
libtpu: 0.0.40
codegen_flags: <defaults>
</compile_context>

<pallas_src>
import functools

import jax
import jax.numpy as jnp
from jax.experimental import pallas as pl
from jax.experimental.pallas import tpu as pltpu


def _round_up(x, m):
    return ((x + m - 1) // m) * m


def _choose_batch_tile(B):
    """Balanced batch tiles: multiple of 16, <= ~2048 rows, >= 2 tiles when
    B is large enough so both v7x TensorCores get work."""
    if B <= 16:
        return _round_up(max(B, 1), 8)
    num_tiles = max(2, pl.cdiv(B, 2048))
    return _round_up(pl.cdiv(B, num_tiles), 16)


def actor_kernel(obs_ref, act_ref,
                 w1_ref, b1_ref, w2_ref, b2_ref, w3_ref, b3_ref,
                 out_ref, *, act_dim):
    # --- MLP hot path: 3 bf16 matmuls on the MXU, f32 accumulation ---
    x = obs_ref[...].astype(jnp.bfloat16)                        # (TB, obs_dim)
    h1 = jnp.dot(x, w1_ref[...], preferred_element_type=jnp.float32) + b1_ref[...]
    h1 = jnp.maximum(h1, 0.0)                                    # ReLU (f32)
    h2 = jnp.dot(h1.astype(jnp.bfloat16), w2_ref[...],
                 preferred_element_type=jnp.float32) + b2_ref[...]
    h2 = jnp.maximum(h2, 0.0)                                    # ReLU (f32)
    # w3/b3 are zero-padded to OUT_W lanes -> logits is already lane-dense;
    # padded columns hold tanh(0) = 0.
    logits = jnp.tanh(
        jnp.dot(h2.astype(jnp.bfloat16), w3_ref[...],
                preferred_element_type=jnp.float32) + b3_ref[...]
    )                                                            # (TB, OUT_W) f32

    # --- Categorical.log_prob(act) ---
    # logits in [-1, 1] (tanh), so exp cannot overflow: skip max-subtraction.
    col = jax.lax.broadcasted_iota(jnp.int32, logits.shape, 1)   # (TB, OUT_W)
    valid = col < act_dim
    lse = jnp.log(jnp.sum(jnp.where(valid, jnp.exp(logits), 0.0),
                          axis=-1, keepdims=True))               # (TB, 1)

    act = act_ref[...]                                           # (TB, 1) int32
    onehot = col == act
    logp = jnp.sum(jnp.where(onehot, logits, 0.0),
                   axis=-1, keepdims=True) - lse                 # (TB, 1)

    # Single unmasked full-width store: [logits | logp | zeros].
    out_ref[...] = jnp.where(col == act_dim, logp, logits)


def actor_forward(obs, act, params):
    """Returns (logits, logp_a).  `pi` (the Categorical) is represented by its logits."""
    w1, b1, w2, b2, w3, b3 = params
    B, obs_dim = obs.shape
    hidden = w1.shape[1]
    A = w3.shape[1]
    OUT_W = max(128, _round_up(A + 1, 128))      # lane-dense output width

    # Weights -> bf16 (tiny, resident in VMEM).  Last layer zero-padded to
    # OUT_W columns so the kernel's output tile is already 128-lane dense.
    w1b = w1.astype(jnp.bfloat16)
    w2b = w2.astype(jnp.bfloat16)
    w3b = jnp.zeros((hidden, OUT_W), jnp.bfloat16).at[:, :A].set(w3.astype(jnp.bfloat16))
    b1r = b1.reshape(1, hidden).astype(jnp.float32)
    b2r = b2.reshape(1, hidden).astype(jnp.float32)
    b3p = jnp.zeros((1, OUT_W), jnp.float32).at[:, :A].set(b3.reshape(1, A))

    act2d = act.astype(jnp.int32).reshape(B, 1)

    TB = _choose_batch_tile(B)
    grid = (pl.cdiv(B, TB),)                     # partial last block handled by Pallas

    kernel = functools.partial(actor_kernel, act_dim=A)
    resident = lambda shp: pl.BlockSpec(shp, lambda i: (0, 0))   # stays in VMEM

    out = pl.pallas_call(
        kernel,
        out_shape=jax.ShapeDtypeStruct((B, OUT_W), jnp.float32),
        grid=grid,
        in_specs=[
            pl.BlockSpec((TB, obs_dim), lambda i: (i, 0)),  # obs  (TB, obs_dim) f32
            pl.BlockSpec((TB, 1), lambda i: (i, 0)),        # act  (TB, 1) int32
            resident(w1b.shape), resident(b1r.shape),
            resident(w2b.shape), resident(b2r.shape),
            resident(w3b.shape), resident(b3p.shape),
        ],
        out_specs=pl.BlockSpec((TB, OUT_W), lambda i: (i, 0)),
        compiler_params=pltpu.CompilerParams(
            dimension_semantics=("parallel",),
            vmem_limit_bytes=32 * 1024 * 1024,
        ),
    )(obs, act2d, w1b, b1r, w2b, b2r, w3b, b3p)

    logits = out[:, :A]
    logp_a = out[:, A]
    return logits, logp_a


def init_params(key, obs_dim, act_dim, hidden=64):
    ks = jax.random.split(key, 6)

    def lin(kw, kb, fan_in, fan_out):
        bound = 1.0 / jnp.sqrt(fan_in)
        w = jax.random.uniform(kw, (fan_in, fan_out), jnp.float32, -bound, bound)
        b = jax.random.uniform(kb, (1, fan_out), jnp.float32, -bound, bound)
        return w, b

    w1, b1 = lin(ks[0], ks[1], obs_dim, hidden)
    w2, b2 = lin(ks[2], ks[3], hidden, hidden)
    w3, b3 = lin(ks[4], ks[5], hidden, act_dim)
    return (w1, b1, w2, b2, w3, b3)


def actor_forward_ref(obs, act, params):
    """Pure-f32 reference (matches the PyTorch module exactly)."""
    w1, b1, w2, b2, w3, b3 = params
    h1 = jnp.maximum(obs @ w1 + b1, 0.0)
    h2 = jnp.maximum(h1 @ w2 + b2, 0.0)
    logits = jnp.tanh(h2 @ w3 + b3)
    log_sm = jax.nn.log_softmax(logits, axis=-1)
    logp = jnp.take_along_axis(log_sm, act.astype(jnp.int32)[:, None], axis=-1)[:, 0]
    return logits, logp


def _check(B, obs_dim, act_dim, key):
    k_obs, k_act, k_par = jax.random.split(key, 3)
    obs = jax.random.normal(k_obs, (B, obs_dim), jnp.float32)
    act = jax.random.randint(k_act, (B,), 0, act_dim, jnp.int32)
    params = init_params(k_par, obs_dim, act_dim)

    logits, logp_a = actor_forward(obs, act, params)
    jax.block_until_ready((logits, logp_a))

    # Tolerances account for the intentional bf16 cast of obs/weights
    # (matmuls still accumulate in f32; tanh bounds logits to [-1, 1]).
    ref_logits, ref_logp = actor_forward_ref(obs, act, params)
    assert jnp.allclose(logits, ref_logits, atol=3e-2, rtol=3e-2)
    assert jnp.allclose(logp_a, ref_logp, atol=5e-2, rtol=5e-2)


if __name__ == "__main__":
    key = jax.random.PRNGKey(0)
    k0, k1 = jax.random.split(key)

    # Small canonical case (single full tile).
    _check(B=8, obs_dim=32, act_dim=8, key=k0)
    # Ragged batch: exercises the partial-last-block path (no wrapper padding).
    _check(B=20, obs_dim=32, act_dim=8, key=k1)

    print("KERNEL_OK")
</pallas_src>

<mosaic_0001>
module attributes {stable_mosaic.version = 11 : i64} {
  func.func @actor_kernel(%arg0: i32, %arg1: memref<8x32xf32, #tpu.memory_space<vmem>>, %arg2: memref<8x1xi32, #tpu.memory_space<vmem>>, %arg3: memref<32x64xbf16, #tpu.memory_space<vmem>>, %arg4: memref<1x64xf32, #tpu.memory_space<vmem>>, %arg5: memref<64x64xbf16, #tpu.memory_space<vmem>>, %arg6: memref<1x64xf32, #tpu.memory_space<vmem>>, %arg7: memref<64x128xbf16, #tpu.memory_space<vmem>>, %arg8: memref<1x128xf32, #tpu.memory_space<vmem>>, %arg9: memref<8x128xf32, #tpu.memory_space<vmem>>) attributes {dimension_semantics = [#tpu.dimension_semantics<parallel>], iteration_bounds = array<i64: 1>, scalar_prefetch = 0 : i64, scratch_operands = 0 : i64, tpu.core_type = #tpu.core_type<tc>, window_params = [{transform_indices = @transform_0, window_bounds = array<i64: 8, 32>}, {transform_indices = @transform_1, window_bounds = array<i64: 8, 1>}, {pipeline_mode = #tpu.pipeline_mode<synchronous>, transform_indices = @transform_2, window_bounds = array<i64: 32, 64>}, {pipeline_mode = #tpu.pipeline_mode<synchronous>, transform_indices = @transform_3, window_bounds = array<i64: 1, 64>}, {pipeline_mode = #tpu.pipeline_mode<synchronous>, transform_indices = @transform_4, window_bounds = array<i64: 64, 64>}, {pipeline_mode = #tpu.pipeline_mode<synchronous>, transform_indices = @transform_5, window_bounds = array<i64: 1, 64>}, {pipeline_mode = #tpu.pipeline_mode<synchronous>, transform_indices = @transform_6, window_bounds = array<i64: 64, 128>}, {pipeline_mode = #tpu.pipeline_mode<synchronous>, transform_indices = @transform_7, window_bounds = array<i64: 1, 128>}, {transform_indices = @transform_8, window_bounds = array<i64: 8, 128>}]} {
    %c0 = arith.constant 0 : index
    %c0_0 = arith.constant 0 : index
    %0 = vector.load %arg1[%c0, %c0_0] : memref<8x32xf32, #tpu.memory_space<vmem>>, vector<8x32xf32>
    %1 = arith.truncf %0 : vector<8x32xf32> to vector<8x32xbf16>
    %c0_1 = arith.constant 0 : index
    %c0_2 = arith.constant 0 : index
    %2 = vector.load %arg3[%c0_1, %c0_2] : memref<32x64xbf16, #tpu.memory_space<vmem>>, vector<32x64xbf16>
    %cst = arith.constant dense<0.000000e+00> : vector<8x64xf32>
    %3 = tpu.matmul %1, %2, %cst {dimension_numbers = #tpu.dot_dimension_numbers<[1], [0], [0], [1], [0, 0, 1, 1], [], []>} : vector<8x32xbf16>, vector<32x64xbf16>, vector<8x64xf32> -> vector<8x64xf32>
    %c0_3 = arith.constant 0 : index
    %c0_4 = arith.constant 0 : index
    %4 = vector.load %arg4[%c0_3, %c0_4] : memref<1x64xf32, #tpu.memory_space<vmem>>, vector<1x64xf32>
    %5 = vector.broadcast %4 : vector<1x64xf32> to vector<8x64xf32>
    %6 = arith.addf %3, %5 : vector<8x64xf32>
    %cst_5 = arith.constant 0.000000e+00 : f32
    %7 = vector.broadcast %cst_5 : f32 to vector<8x64xf32>
    %8 = arith.maximumf %6, %7 : vector<8x64xf32>
    %9 = arith.truncf %8 : vector<8x64xf32> to vector<8x64xbf16>
    %c0_6 = arith.constant 0 : index
    %c0_7 = arith.constant 0 : index
    %10 = vector.load %arg5[%c0_6, %c0_7] : memref<64x64xbf16, #tpu.memory_space<vmem>>, vector<64x64xbf16>
    %cst_8 = arith.constant dense<0.000000e+00> : vector<8x64xf32>
    %11 = tpu.matmul %9, %10, %cst_8 {dimension_numbers = #tpu.dot_dimension_numbers<[1], [0], [0], [1], [0, 0, 1, 1], [], []>} : vector<8x64xbf16>, vector<64x64xbf16>, vector<8x64xf32> -> vector<8x64xf32>
    %c0_9 = arith.constant 0 : index
    %c0_10 = arith.constant 0 : index
    %12 = vector.load %arg6[%c0_9, %c0_10] : memref<1x64xf32, #tpu.memory_space<vmem>>, vector<1x64xf32>
    %13 = vector.broadcast %12 : vector<1x64xf32> to vector<8x64xf32>
    %14 = arith.addf %11, %13 : vector<8x64xf32>
    %cst_11 = arith.constant 0.000000e+00 : f32
    %15 = vector.broadcast %cst_11 : f32 to vector<8x64xf32>
    %16 = arith.maximumf %14, %15 : vector<8x64xf32>
    %17 = arith.truncf %16 : vector<8x64xf32> to vector<8x64xbf16>
    %c0_12 = arith.constant 0 : index
    %c0_13 = arith.constant 0 : index
    %18 = vector.load %arg7[%c0_12, %c0_13] : memref<64x128xbf16, #tpu.memory_space<vmem>>, vector<64x128xbf16>
    %cst_14 = arith.constant dense<0.000000e+00> : vector<8x128xf32>
    %19 = tpu.matmul %17, %18, %cst_14 {dimension_numbers = #tpu.dot_dimension_numbers<[1], [0], [0], [1], [0, 0, 1, 1], [], []>} : vector<8x64xbf16>, vector<64x128xbf16>, vector<8x128xf32> -> vector<8x128xf32>
    %c0_15 = arith.constant 0 : index
    %c0_16 = arith.constant 0 : index
    %20 = vector.load %arg8[%c0_15, %c0_16] : memref<1x128xf32, #tpu.memory_space<vmem>>, vector<1x128xf32>
    %21 = vector.broadcast %20 : vector<1x128xf32> to vector<8x128xf32>
    %22 = arith.addf %19, %21 : vector<8x128xf32>
    %23 = math.tanh %22 : vector<8x128xf32>
    %24 = tpu.iota {dimensions = array<i32: 1>} : vector<8x128xi32>
    %c8_i32 = arith.constant 8 : i32
    %25 = vector.broadcast %c8_i32 : i32 to vector<8x128xi32>
    %26 = arith.cmpi slt, %24, %25 : vector<8x128xi32>
    %27 = math.exp %23 : vector<8x128xf32>
    %cst_17 = arith.constant 0.000000e+00 : f32
    %28 = vector.broadcast %cst_17 : f32 to vector<8x128xf32>
    %29 = arith.select %26, %27, %28 : vector<8x128xi1>, vector<8x128xf32>
    %cst_18 = arith.constant dense<0.000000e+00> : vector<8xf32>
    %30 = vector.multi_reduction <add>, %29, %cst_18 [1] : vector<8x128xf32> to vector<8xf32>
    %31 = vector.shape_cast %30 : vector<8xf32> to vector<8x1xf32>
    %32 = math.log %31 : vector<8x1xf32>
    %c0_19 = arith.constant 0 : index
    %c0_20 = arith.constant 0 : index
    %33 = vector.load %arg2[%c0_19, %c0_20] : memref<8x1xi32, #tpu.memory_space<vmem>>, vector<8x1xi32>
    %34 = vector.broadcast %33 : vector<8x1xi32> to vector<8x128xi32>
    %35 = arith.cmpi eq, %24, %34 : vector<8x128xi32>
    %cst_21 = arith.constant 0.000000e+00 : f32
    %36 = vector.broadcast %cst_21 : f32 to vector<8x128xf32>
    %37 = arith.select %35, %23, %36 : vector<8x128xi1>, vector<8x128xf32>
    %cst_22 = arith.constant dense<0.000000e+00> : vector<8xf32>
    %38 = vector.multi_reduction <add>, %37, %cst_22 [1] : vector<8x128xf32> to vector<8xf32>
    %39 = vector.shape_cast %38 : vector<8xf32> to vector<8x1xf32>
    %40 = arith.subf %39, %32 : vector<8x1xf32>
    %c8_i32_23 = arith.constant 8 : i32
    %41 = vector.broadcast %c8_i32_23 : i32 to vector<8x128xi32>
    %42 = arith.cmpi eq, %24, %41 : vector<8x128xi32>
    %43 = vector.shape_cast %40 : vector<8x1xf32> to vector<8x1xf32>
    %44 = vector.broadcast %43 : vector<8x1xf32> to vector<8x128xf32>
    %45 = arith.select %42, %44, %23 : vector<8x128xi1>, vector<8x128xf32>
    %c0_24 = arith.constant 0 : index
    %c0_25 = arith.constant 0 : index
    %46 = vector.load %arg9[%c0_24, %c0_25] : memref<8x128xf32, #tpu.memory_space<vmem>>, vector<8x128xf32>
    tpu.vector_store %arg9[%c0_24, %c0_25], %45 {strides = array<i32>} : memref<8x128xf32, #tpu.memory_space<vmem>>, vector<8x128xf32>,
    return
  }
  func.func @transform_0(%arg0: i32) -> (i32, i32) {
    %c0_i32 = arith.constant 0 : i32
    %c0_i32_0 = arith.constant 0 : i32
    return %arg0, %c0_i32 : i32, i32
  }
  func.func @transform_1(%arg0: i32) -> (i32, i32) {
    %c0_i32 = arith.constant 0 : i32
    %c0_i32_0 = arith.constant 0 : i32
    return %arg0, %c0_i32 : i32, i32
  }
  func.func @transform_2(%arg0: i32) -> (i32, i32) {
    %c0_i32 = arith.constant 0 : i32
    %c0_i32_0 = arith.constant 0 : i32
    %c0_i32_1 = arith.constant 0 : i32
    return %c0_i32, %c0_i32_0 : i32, i32
  }
  func.func @transform_3(%arg0: i32) -> (i32, i32) {
    %c0_i32 = arith.constant 0 : i32
    %c0_i32_0 = arith.constant 0 : i32
    %c0_i32_1 = arith.constant 0 : i32
    return %c0_i32, %c0_i32_0 : i32, i32
  }
  func.func @transform_4(%arg0: i32) -> (i32, i32) {
    %c0_i32 = arith.constant 0 : i32
    %c0_i32_0 = arith.constant 0 : i32
    %c0_i32_1 = arith.constant 0 : i32
    return %c0_i32, %c0_i32_0 : i32, i32
  }
  func.func @transform_5(%arg0: i32) -> (i32, i32) {
    %c0_i32 = arith.constant 0 : i32
    %c0_i32_0 = arith.constant 0 : i32
    %c0_i32_1 = arith.constant 0 : i32
    return %c0_i32, %c0_i32_0 : i32, i32
  }
  func.func @transform_6(%arg0: i32) -> (i32, i32) {
    %c0_i32 = arith.constant 0 : i32
    %c0_i32_0 = arith.constant 0 : i32
    %c0_i32_1 = arith.constant 0 : i32
    return %c0_i32, %c0_i32_0 : i32, i32
  }
  func.func @transform_7(%arg0: i32) -> (i32, i32) {
    %c0_i32 = arith.constant 0 : i32
    %c0_i32_0 = arith.constant 0 : i32
    %c0_i32_1 = arith.constant 0 : i32
    return %c0_i32, %c0_i32_0 : i32, i32
  }
  func.func @transform_8(%arg0: i32) -> (i32, i32) {
    %c0_i32 = arith.constant 0 : i32
    %c0_i32_0 = arith.constant 0 : i32
    return %arg0, %c0_i32 : i32, i32
  }
}

</mosaic_0001>

<bundles_post_ra>
// kernel: tpu_custom_call.1
= control target key start
LH: loop header
LB: loop body
LE: loop exit
PB: predicated region body
PF: predicated region fallthrough
CT: control target
= control target key end

     0   :  { %13 = vsyncpa [#allocation3], 0  ;;  %s659_s0 = inlined_call_operand.hbm [shape: f32[8,32], index: 0, kind: input, shape index: {}]   ;;  %s660_s1 = inlined_call_operand.vmem [shape: s32[8,1], index: 1, kind: input, shape index: {}]   ;;  %s661_s2 = inlined_call_operand.vmem [shape: bf16[32,64], index: 2, kind: input, shape index: {}]   ;;  %s662_s3 = inlined_call_operand.vmem [shape: f32[1,64], index: 3, kind: input, shape index: {}]   ;;  %s663_s4 = inlined_call_operand.hbm [shape: bf16[64,64], index: 4, kind: input, shape index: {}]   ;;  %s664_s5 = inlined_call_operand.vmem [shape: f32[1,64], index: 5, kind: input, shape index: {}]   ;;  %s665_s6 = inlined_call_operand.hbm [shape: bf16[64,128], index: 6, kind: input, shape index: {}]   ;;  %s666_s7 = inlined_call_operand.vmem [shape: f32[1,128], index: 7, kind: input, shape index: {}]   ;;  %s667_s8 = inlined_call_operand.hbm [shape: f32[8,128], index: 8, kind: output, shape index: {}]  }
   0x1   :  { %14 = vsyncpa [#allocation6], 0 }
   0x2   :  { %15 = vsyncpa [#allocation4], 0  ;;  %s528_s27 = smov [#allocation5]   ;;  %s434_s9 = scalar_lea.hbm %s663_s4, 512 }
   0x3   :  { %s37_s28 = sshll.u32 %s528_s27, 4  ;;  %p435_p0 = scmp.ne.s32.totalorder %s663_s4, %s434_s9  ;;  %s38_s28 = int_to_ptr.vmem [resolvable:$true] %s37_s28 }
   0x4   :  { %p438_p1 = scmp.lt.u32.totalorder %s434_s9, %s663_s4 }
   0x6   :  { %p440_p2 = pnand %p438_p1, %p435_p0 }
   0x8   :  { %443 = shalt.err (!%p440_p2)
}
   0x9   :  { %s444_s14 = scalar_lea.vmem %s38_s28, 512  ;;  %p449_p4 = scmp.lt.s32.totalorder %s38_s28, %s38_s28 }
   0xa   :  { %p445_p3 = scmp.ne.s32.totalorder %s38_s28, %s444_s14  ;;  %p450_p5 = scmp.lt.s32.totalorder %s444_s14, %s444_s14 }
   0xc   :  { %p451_p6 = por %p450_p5, %p449_p4 }
   0xe   :  { %p452_p7 = pnand %p451_p6, %p445_p3 }
  0x10   :  { %455 = shalt.err (!%p452_p7)
}
  0x11   :  { %s529_s15 = smov 64   ;;  %s530_s16 = smov 4  }
  0x12   :  { %43 = dma.hbm_to_vmem [thread:$0]  %s663_s4, 512, %s38_s28, [#allocation6], %s529_s15, %s529_s15, %s530_s16  }
  0x13   :  { %s531_s19 = smov [#allocation2]   ;;  %s532_s21 = smov [#allocation7]  }
  0x14   :  { %s22_s20 = sshll.u32 %s531_s19, 4  ;;  %s51_s22 = sshll.u32 %s532_s21, 4  ;;  %s23_s20 = int_to_ptr.vmem [resolvable:$true] %s22_s20  ;;  %s52_s22 = int_to_ptr.vmem [resolvable:$true] %s51_s22 }
  0x15   :  { %s456_s25 = scalar_lea.hbm %s659_s0, 128 }
  0x16   :  { %p457_p8 = scmp.ne.s32.totalorder %s659_s0, %s456_s25  ;;  %p460_p9 = scmp.lt.u32.totalorder %s456_s25, %s659_s0 }
  0x18   :  { %p462_p10 = pnand %p460_p9, %p457_p8 }
  0x1a   :  { %465 = shalt.err (!%p462_p10)
}
  0x1b   :  { %s466_s4 = scalar_lea.vmem %s23_s20, 128  ;;  %p471_p12 = scmp.lt.s32.totalorder %s23_s20, %s23_s20 }
  0x1c   :  { %p467_p11 = scmp.ne.s32.totalorder %s23_s20, %s466_s4  ;;  %p472_p13 = scmp.lt.s32.totalorder %s466_s4, %s466_s4 }
  0x1e   :  { %p473_p0 = por %p472_p13, %p471_p12 }
  0x20   :  { %p474_p1 = pnand %p473_p0, %p467_p11 }
  0x22   :  { %477 = shalt.err (!%p474_p1)
}
  0x23   :  { %25 = dma.hbm_to_vmem [thread:$0]  %s659_s0, 128, %s23_s20, [#allocation3]  }
  0x24   :  { %s478_s12 = scalar_lea.hbm %s665_s6, 512 }
  0x25   :  { %p479_p2 = scmp.ne.s32.totalorder %s665_s6, %s478_s12  ;;  %p482_p3 = scmp.lt.u32.totalorder %s478_s12, %s665_s6 }
  0x27   :  { %p484_p4 = pnand %p482_p3, %p479_p2 }
  0x29   :  { %487 = shalt.err (!%p484_p4)
}
  0x2a   :  { %s488_s19 = scalar_lea.vmem %s52_s22, 512  ;;  %p493_p6 = scmp.lt.s32.totalorder %s52_s22, %s52_s22 }
  0x2b   :  { %p489_p5 = scmp.ne.s32.totalorder %s52_s22, %s488_s19  ;;  %p494_p7 = scmp.lt.s32.totalorder %s488_s19, %s488_s19 }
  0x2d   :  { %p495_p8 = por %p494_p7, %p493_p6 }
  0x2f   :  { %p496_p9 = pnand %p495_p8, %p489_p5 }
  0x31   :  { %499 = shalt.err (!%p496_p9)
}
  0x32   :  { %57 = dma.hbm_to_vmem [thread:$0]  %s665_s6, 512, %s52_s22, [#allocation6], %s529_s15, %s529_s15, %s530_s16  }
  0x33   :  { %522 = dma.done.wait [#allocation3], 128  }
  0x34   :  { %523 = vsyncadd [#allocation3], 4294967168 }
  0x35   :  { %524 = dma.done.wait [#allocation6], 1024  }
  0x36   :  { %525 = vsyncadd [#allocation6], 4294966272  ;;  %v533_v0 = vmov 0.0   ;;  %vm534_vm0 = vmmov 0   ;;  %v418_v1 = vld [vmem:[%s661_s2] sm:$0xff]   ;;  %v419_v2 = vld [vmem:[%s661_s2 + $0x8] sm:$0xff]   ;;  %v309_v37 = vlaneseq }
  0x37   :  { %376 = vmatprep.subr.bf16.mxu0 %v533_v0  ;;  %380 = vmatprep.mubr.msk.bf16.mxu0 %vm534_vm0, %v533_v0  ;;  %v70_v3 = vld [vmem:[#allocation2] sm:$0xff]  ;;  %v420_v4 = vld [vmem:[#allocation5] sm:$0xff]   ;;  %vm95_vm1 = vcmask 261120   ;;  %v421_v5 = vld [vmem:[#allocation5 + $0x8] sm:$0xff]   ;;  %vm180_vm2 = vcmask 523264   ;;  %v535_v22 = vmov 0  }
  0x38   :  { %384 = vmatprep.subr.bf16.mxu1 %v533_v0  ;;  %392 = vmatprep.mubr.msk.bf16.mxu1 %vm534_vm0, %v533_v0  ;;  %v71_v6 = vpack.c.bf16 %v70_v3, %v70_v3  ;;  %v422_v7 = vld [vmem:[#allocation5 + $0x10] sm:$0xff]   ;;  %v423_v8 = vld [vmem:[#allocation5 + $0x18] sm:$0xff]   ;;  %v424_v9 = vld [vmem:[#allocation7] sm:$0xff]   ;;  %v310_v38 = vand.u32 127, %v309_v37 }
  0x39   :  { %377 = vmatpush3.bf16.msra.mxu0 %v418_v1  ;;  %385 = vmatpush3.bf16.msra.mxu1 %v420_v4  ;;  %v425_v10 = vld [vmem:[#allocation7 + $0x8] sm:$0xff]   ;;  %v347_v11 = vld [vmem:[%s662_s3] ss:$0 sm:$0xff]  ;;  %v426_v19 = vld [vmem:[#allocation7 + $0x10] sm:$0xff]  }
  0x3a   :  { %378 = vmatprep.subr.bf16.mxu0 %v533_v0  ;;  %386 = vmatprep.subr.bf16.mxu1 %v533_v0  ;;  %v427_v20 = vld [vmem:[#allocation7 + $0x18] sm:$0xff]   ;;  %vm311_vm4 = vcmp.lt.s32.totalorder %v310_v38, 8  ;;  %vm328_vm5 = vcmp.eq.s32.totalorder %v310_v38, 8 }
  0x3b   :  { %v319_v21 = vld [vmem:[%s660_s1] sm:$0xff]  ;;  %417 = vset.pattern.permute.xlu0 %v535_v22  ;;  %s536_s1 = smov [#allocation8]  }
  0x3c   :  { %321 = vperm.xlu0 %417, %v319_v21   ;;  %v351_v23 = vld [vmem:[%s664_s5] ss:$0 sm:$0xff]  ;;  %s337_s5 = sshll.u32 %s536_s1, 4  ;;  %s338_s5 = int_to_ptr.vmem [resolvable:$true] %s337_s5 }
  0x3d   :  { %379 = vmatpush3.bf16.msra.mxu0 %v419_v2  ;;  %387 = vmatpush3.bf16.msra.mxu1 %v421_v5  ;;  %v357_v31 = vld [vmem:[%s666_s7] ss:$0 sm:$0xff]  ;;  %s500_s7 = scalar_lea.vmem %s338_s5, 128  ;;  %p505_p11 = scmp.lt.s32.totalorder %s338_s5, %s338_s5 }
  0x3e   :  { %396 = vmatprep.subr.bf16.mxu0 %v533_v0  ;;  %388 = vmatprep.subr.bf16.mxu1 %v533_v0  ;;  %p501_p10 = scmp.ne.s32.totalorder %s338_s5, %s500_s7  ;;  %p506_p12 = scmp.lt.s32.totalorder %s500_s7, %s500_s7 }
  0x40   :  { %381 = vmatmul.mubr.msk.bf16.vlgmr.msra.gmra.mrb[0].mxu0 %vm95_vm1, %v71_v6  ;;  %p507_p13 = por %p506_p12, %p505_p11 }
  0x41   :  { %404 = vmatprep.mubr.msk.bf16.mxu0 %vm534_vm0, %v533_v0  ;;  %389 = vmatpush3.bf16.msra.mxu1 %v422_v7 }
  0x42   :  { %390 = vmatprep.subr.bf16.mxu1 %v533_v0  ;;  %397 = vmatpush3.bf16.msra.mxu0 %v424_v9  ;;  %p508_p0 = pnand %p507_p13, %p501_p10 }
  0x43   :  { %398 = vmatprep.subr.bf16.mxu0 %v533_v0 }
  0x45   :  { %391 = vmatpush3.bf16.msra.mxu1 %v423_v8 }
  0x46   :  { %399 = vmatpush3.bf16.msra.mxu0 %v425_v10 }
  0x47   :  { %400 = vmatprep.subr.bf16.mxu0 %v533_v0 }
  0x4a   :  { %401 = vmatpush3.bf16.msra.mxu0 %v426_v19 }
  0x4b   :  { %402 = vmatprep.subr.bf16.mxu0 %v533_v0 }
  0x4e   :  { %403 = vmatpush3.bf16.msra.mxu0 %v427_v20 }
  0xbb   :  { %v322_v39 = vpop.permute.xlu0 %321 }
  0xbc   :  { %vm323_vm3 = vcmp.eq.s32.totalorder %v310_v38, %v322_v39 }
 0x113   :  { %v133_v12 = vpop.f32.mrb[0].mxu0 }
 0x114   :  { %v134_v13 = vadd.f32 %v347_v11, %v133_v12  ;;  %v382_v14 = vpop.f32.mrb[1].mxu0 }
 0x115   :  { %v136_v15 = vpop.f32.mrb[2].mxu0 }
 0x116   :  { %v139_v16 = vmax.f32 %v134_v13, 0.0  ;;  %v383_v17 = vpop.f32.mrb[3].mxu0 }
 0x118   :  { %v140_v18 = vpack.c.bf16 %v139_v16, %v139_v16 }
 0x11a   :  { %393 = vmatmul.mubr.msk.bf16.vlgmr.msra.gmra.mrb[0].mxu1 %vm180_vm2, %v140_v18 }
 0x1ed   :  { %v218_v24 = vpop.f32.mrb[0].mxu1 }
 0x1ee   :  { %v219_v25 = vadd.f32 %v351_v23, %v218_v24  ;;  %v394_v26 = vpop.f32.mrb[1].mxu1 }
 0x1ef   :  { %v221_v27 = vpop.f32.mrb[2].mxu1 }
 0x1f0   :  { %v224_v28 = vmax.f32 %v219_v25, 0.0  ;;  %v395_v29 = vpop.f32.mrb[3].mxu1 }
 0x1f2   :  { %v225_v30 = vpack.c.bf16 %v224_v28, %v224_v28 }
 0x1f4   :  { %405 = vmatmul.mubr.msk.bf16.vlgmr.msra.gmra.mrb[4].mxu0 %vm180_vm2, %v225_v30 }
 0x2c7   :  { %v302_v32 = vpop.f32.mrb[4].mxu0 }
 0x2c8   :  { %v303_v33 = vadd.f32 %v357_v31, %v302_v32  ;;  %v406_v34 = vpop.f32.mrb[5].mxu0 }
 0x2c9   :  { %v305_v35 = vpop.f32.mrb[6].mxu0 }
 0x2ca   :  { %428 = vtanh.f32 %v303_v33  ;;  %v407_v36 = vpop.f32.mrb[7].mxu0 }
 0x2d4   :  { %v429_v40 = vpop.eup %428 }
 0x2d5   :  { %v324_v41 = vsel %vm323_vm3, %v429_v40, 0.0  ;;  %v312_v42 = vmul.f32 1.442695, %v429_v40 }
 0x2d6   :  { %325 = vadd.xlane.f32.xlu1 %v324_v41 }
 0x2d7   :  { %430 = vpow2.f32 %v312_v42 }
 0x2e1   :  { %v431_v43 = vpop.eup %430 }
 0x2e2   :  { %v314_v44 = vsel %vm311_vm4, %v431_v43, 0.0 }
 0x2e3   :  { %315 = vadd.xlane.f32.xlu0 %v314_v44 }
 0x363   :  { %v326_v48 = vpop.xlane.xlu1 %325 }
 0x370   :  { %v316_v45 = vpop.xlane.xlu0 %315 }
 0x371   :  { %432 = vlog2.f32 %v316_v45 }
 0x37b   :  { %v433_v46 = vpop.eup %432 }
 0x37c   :  { %v318_v47 = vmul.f32 0.6931472, %v433_v46 }
 0x37e   :  { %v327_v49 = vsub.f32 %v326_v48, %v318_v47 }
 0x380   :  { %v329_v50 = vsel %vm328_vm5, %v327_v49, %v429_v40 }
 0x381   :  { %330 = vst [vmem:[#allocation8] sm:$0xff] %v329_v50 }
 0x382   :  { %511 = shalt.err (!%p508_p0)
}
 0x383   :  { %s512_s4 = scalar_lea.hbm %s667_s8, 128 }
 0x384   :  { %p513_p1 = scmp.ne.s32.totalorder %s667_s8, %s512_s4  ;;  %p516_p2 = scmp.lt.u32.totalorder %s512_s4, %s667_s8 }
 0x386   :  { %p518_p3 = pnand %p516_p2, %p513_p1 }
 0x388   :  { %521 = shalt.err (!%p518_p3)
}
 0x389   :  { %340 = dma.vmem_to_hbm [thread:$0]  %s338_s5, 128, %s667_s8, [#allocation4]  }
 0x38a   :  { %526 = dma.done.wait [#allocation4], 128  }
 0x38b   :  { %527 = vsyncadd [#allocation4], 4294967168 }
 0x38c   :  { %344 = vsyncpa [#allocation3], 1 }
 0x38d   :  { %345 = vsyncpa [#allocation6], 1 }
 0x38e   :  { %346 = vsyncpa [#allocation4], 1 }

</bundles_post_ra>
